<compile_context>
chip_gen: v7x
topology: tpu7x:2x2x1
jax: 0.10.0
libtpu: 0.0.40
codegen_flags: <defaults>
</compile_context>

<pallas_src>
import functools

import jax
import jax.numpy as jnp
from jax.experimental import pallas as pl
from jax.experimental.pallas import tpu as pltpu

FEAT = 151  # input/output feature width of the autoencoder


def _round_up(x, m):
    return ((x + m - 1) // m) * m


def _ae_kernel(x_ref,
               w1_ref, b1_ref,
               w2_ref, b2_ref,
               w3_ref, b3_ref,
               w4_ref, b4_ref,
               o_ref):
    """Fused encoder+decoder forward for one batch tile, entirely in VMEM."""
    cdt = w1_ref.dtype                        # MXU operand dtype (bf16 or f32)
    x = x_ref[...].astype(cdt)                # cast in-kernel on the VPU

    # encoder: Linear(151 -> 64) + ReLU      (f32 accumulate, f32 epilogue)
    h1 = jnp.dot(x, w1_ref[...], preferred_element_type=jnp.float32) + b1_ref[...]
    h1 = jnp.maximum(h1, 0.0)

    # encoder: Linear(64 -> L) + ReLU
    z = jnp.dot(h1.astype(cdt), w2_ref[...],
                preferred_element_type=jnp.float32) + b2_ref[...]
    z = jnp.maximum(z, 0.0)

    # decoder: Linear(L -> 64) + ReLU
    h2 = jnp.dot(z.astype(cdt), w3_ref[...],
                 preferred_element_type=jnp.float32) + b3_ref[...]
    h2 = jnp.maximum(h2, 0.0)

    # decoder: Linear(64 -> 151) + Sigmoid (exp + approx reciprocal: both EUP)
    y = jnp.dot(h2.astype(cdt), w4_ref[...],
                preferred_element_type=jnp.float32) + b4_ref[...]
    e = jnp.exp(-y)
    o_ref[...] = pl.reciprocal(1.0 + e, approx=True).astype(o_ref.dtype)


@functools.partial(jax.jit, static_argnames=("block_batch", "use_bf16", "out_bf16"))
def autoencoder_forward(x, params, *, block_batch=4096, use_bf16=True,
                        out_bf16=False):
    """x: [B, 151] float32. params: dict from init_params(). Returns [B, 151]."""
    B = x.shape[0]
    L = params["w2"].shape[1]
    cdt = jnp.bfloat16 if use_bf16 else jnp.float32
    out_dtype = jnp.bfloat16 if out_bf16 else jnp.float32

    # ---- batch tile selection: prefer a tile that divides B exactly ----------
    tb = max(8, _round_up(min(block_batch, B), 8))
    if B % tb != 0:
        for cand in range(tb, 7, -8):   # largest multiple of 8 that divides B
            if B % cand == 0:
                tb = cand
                break
    Bp = _round_up(B, tb)

    # Only pad the batch dim when unavoidable (B not a multiple of 8).
    xp = x if Bp == B else jnp.zeros((Bp, FEAT), x.dtype).at[:B].set(x)

    w1 = params["w1"].astype(cdt)   # (151, 64)
    w2 = params["w2"].astype(cdt)   # (64, L)
    w3 = params["w3"].astype(cdt)   # (L, 64)
    w4 = params["w4"].astype(cdt)   # (64, 151)
    b1, b2, b3, b4 = params["b1"], params["b2"], params["b3"], params["b4"]  # f32

    args = (xp, w1, b1, w2, b2, w3, b3, w4, b4)

    grid = (Bp // tb,)
    x_spec = pl.BlockSpec((tb, FEAT), lambda i: (i, 0))
    out_spec = pl.BlockSpec((tb, FEAT), lambda i: (i, 0))
    # weights/biases: full-array blocks, constant index -> DMA'd once, resident
    resident = lambda a: pl.BlockSpec(a.shape, lambda i: (0, 0))
    in_specs = [x_spec] + [resident(a) for a in args[1:]]

    flops = 2 * Bp * (FEAT * 64 + 64 * L + L * 64 + 64 * FEAT)
    bytes_accessed = (sum(a.size * a.dtype.itemsize for a in args)
                      + Bp * FEAT * jnp.dtype(out_dtype).itemsize)
    cost = pl.CostEstimate(flops=flops,
                           transcendentals=2 * Bp * FEAT,  # exp + reciprocal
                           bytes_accessed=bytes_accessed)

    out = pl.pallas_call(
        _ae_kernel,
        out_shape=jax.ShapeDtypeStruct((Bp, FEAT), out_dtype),
        grid=grid,
        in_specs=in_specs,
        out_specs=out_spec,
        compiler_params=pltpu.CompilerParams(
            dimension_semantics=("parallel",),
            vmem_limit_bytes=32 * 1024 * 1024,   # v7x-safe scoped limit
        ),
        cost_estimate=cost,
    )(*args)

    return out if Bp == B else out[:B]


def init_params(key, latent_size):
    """Deterministic init mirroring PyTorch nn.Linear default (uniform +/- 1/sqrt(fan_in)).
    Weights are stored transposed relative to PyTorch, i.e. (in_features, out_features)."""
    dims = [(FEAT, 64), (64, latent_size), (latent_size, 64), (64, FEAT)]
    params = {}
    for i, (fan_in, fan_out) in enumerate(dims, start=1):
        key, kw, kb = jax.random.split(key, 3)
        bound = 1.0 / jnp.sqrt(float(fan_in))
        params[f"w{i}"] = jax.random.uniform(
            kw, (fan_in, fan_out), jnp.float32, minval=-bound, maxval=bound)
        params[f"b{i}"] = jax.random.uniform(
            kb, (1, fan_out), jnp.float32, minval=-bound, maxval=bound)
    return params


def _reference_forward(x, params, use_bf16=True):
    """Pure-JAX reference mirroring the kernel's dtype choices (bf16 operands,
    f32 accumulation, f32 elementwise epilogue, exact sigmoid)."""
    cdt = jnp.bfloat16 if use_bf16 else jnp.float32

    def lin(a, w, b):
        return jnp.dot(a.astype(cdt), w.astype(cdt),
                       preferred_element_type=jnp.float32) + b

    h = jnp.maximum(lin(x, params["w1"], params["b1"]), 0.0)
    z = jnp.maximum(lin(h, params["w2"], params["b2"]), 0.0)
    d = jnp.maximum(lin(z, params["w3"], params["b3"]), 0.0)
    return jax.nn.sigmoid(lin(d, params["w4"], params["b4"]))


if __name__ == "__main__":
    latent_size = 32
    batch = 8

    key = jax.random.PRNGKey(0)
    key, kx = jax.random.split(key)
    x = jax.random.normal(kx, (batch, FEAT), dtype=jnp.float32)
    params = init_params(key, latent_size)

    out = autoencoder_forward(x, params)
    out = jax.block_until_ready(out)

    ref = _reference_forward(x, params)
    assert out.shape == (batch, FEAT)
    # tolerance covers bf16 operands + approx reciprocal in the sigmoid epilogue
    assert jnp.allclose(out, ref, atol=2e-3, rtol=2e-3), float(jnp.max(jnp.abs(out - ref)))

    print("KERNEL_OK")
</pallas_src>

<mosaic_0001>
module attributes {stable_mosaic.version = 11 : i64} {
  func.func @_ae_kernel(%arg0: i32, %arg1: memref<8x151xf32, #tpu.memory_space<vmem>>, %arg2: memref<151x64xbf16, #tpu.memory_space<vmem>>, %arg3: memref<1x64xf32, #tpu.memory_space<vmem>>, %arg4: memref<64x32xbf16, #tpu.memory_space<vmem>>, %arg5: memref<1x32xf32, #tpu.memory_space<vmem>>, %arg6: memref<32x64xbf16, #tpu.memory_space<vmem>>, %arg7: memref<1x64xf32, #tpu.memory_space<vmem>>, %arg8: memref<64x151xbf16, #tpu.memory_space<vmem>>, %arg9: memref<1x151xf32, #tpu.memory_space<vmem>>, %arg10: memref<8x151xf32, #tpu.memory_space<vmem>>) attributes {dimension_semantics = [#tpu.dimension_semantics<parallel>], iteration_bounds = array<i64: 1>, scalar_prefetch = 0 : i64, scratch_operands = 0 : i64, tpu.core_type = #tpu.core_type<tc>, window_params = [{transform_indices = @transform_0, window_bounds = array<i64: 8, 151>}, {pipeline_mode = #tpu.pipeline_mode<synchronous>, transform_indices = @transform_1, window_bounds = array<i64: 151, 64>}, {pipeline_mode = #tpu.pipeline_mode<synchronous>, transform_indices = @transform_2, window_bounds = array<i64: 1, 64>}, {pipeline_mode = #tpu.pipeline_mode<synchronous>, transform_indices = @transform_3, window_bounds = array<i64: 64, 32>}, {pipeline_mode = #tpu.pipeline_mode<synchronous>, transform_indices = @transform_4, window_bounds = array<i64: 1, 32>}, {pipeline_mode = #tpu.pipeline_mode<synchronous>, transform_indices = @transform_5, window_bounds = array<i64: 32, 64>}, {pipeline_mode = #tpu.pipeline_mode<synchronous>, transform_indices = @transform_6, window_bounds = array<i64: 1, 64>}, {pipeline_mode = #tpu.pipeline_mode<synchronous>, transform_indices = @transform_7, window_bounds = array<i64: 64, 151>}, {pipeline_mode = #tpu.pipeline_mode<synchronous>, transform_indices = @transform_8, window_bounds = array<i64: 1, 151>}, {transform_indices = @transform_9, window_bounds = array<i64: 8, 151>}]} {
    %c0 = arith.constant 0 : index
    %c0_0 = arith.constant 0 : index
    %0 = vector.load %arg1[%c0, %c0_0] : memref<8x151xf32, #tpu.memory_space<vmem>>, vector<8x151xf32>
    %1 = arith.truncf %0 : vector<8x151xf32> to vector<8x151xbf16>
    %c0_1 = arith.constant 0 : index
    %c0_2 = arith.constant 0 : index
    %2 = vector.load %arg2[%c0_1, %c0_2] : memref<151x64xbf16, #tpu.memory_space<vmem>>, vector<151x64xbf16>
    %cst = arith.constant dense<0.000000e+00> : vector<8x64xf32>
    %3 = tpu.matmul %1, %2, %cst {dimension_numbers = #tpu.dot_dimension_numbers<[1], [0], [0], [1], [0, 0, 1, 1], [], []>} : vector<8x151xbf16>, vector<151x64xbf16>, vector<8x64xf32> -> vector<8x64xf32>
    %c0_3 = arith.constant 0 : index
    %c0_4 = arith.constant 0 : index
    %4 = vector.load %arg3[%c0_3, %c0_4] : memref<1x64xf32, #tpu.memory_space<vmem>>, vector<1x64xf32>
    %5 = vector.broadcast %4 : vector<1x64xf32> to vector<8x64xf32>
    %6 = arith.addf %3, %5 : vector<8x64xf32>
    %cst_5 = arith.constant 0.000000e+00 : f32
    %7 = vector.broadcast %cst_5 : f32 to vector<8x64xf32>
    %8 = arith.maximumf %6, %7 : vector<8x64xf32>
    %9 = arith.truncf %8 : vector<8x64xf32> to vector<8x64xbf16>
    %c0_6 = arith.constant 0 : index
    %c0_7 = arith.constant 0 : index
    %10 = vector.load %arg4[%c0_6, %c0_7] : memref<64x32xbf16, #tpu.memory_space<vmem>>, vector<64x32xbf16>
    %cst_8 = arith.constant dense<0.000000e+00> : vector<8x32xf32>
    %11 = tpu.matmul %9, %10, %cst_8 {dimension_numbers = #tpu.dot_dimension_numbers<[1], [0], [0], [1], [0, 0, 1, 1], [], []>} : vector<8x64xbf16>, vector<64x32xbf16>, vector<8x32xf32> -> vector<8x32xf32>
    %c0_9 = arith.constant 0 : index
    %c0_10 = arith.constant 0 : index
    %12 = vector.load %arg5[%c0_9, %c0_10] : memref<1x32xf32, #tpu.memory_space<vmem>>, vector<1x32xf32>
    %13 = vector.broadcast %12 : vector<1x32xf32> to vector<8x32xf32>
    %14 = arith.addf %11, %13 : vector<8x32xf32>
    %cst_11 = arith.constant 0.000000e+00 : f32
    %15 = vector.broadcast %cst_11 : f32 to vector<8x32xf32>
    %16 = arith.maximumf %14, %15 : vector<8x32xf32>
    %17 = arith.truncf %16 : vector<8x32xf32> to vector<8x32xbf16>
    %c0_12 = arith.constant 0 : index
    %c0_13 = arith.constant 0 : index
    %18 = vector.load %arg6[%c0_12, %c0_13] : memref<32x64xbf16, #tpu.memory_space<vmem>>, vector<32x64xbf16>
    %cst_14 = arith.constant dense<0.000000e+00> : vector<8x64xf32>
    %19 = tpu.matmul %17, %18, %cst_14 {dimension_numbers = #tpu.dot_dimension_numbers<[1], [0], [0], [1], [0, 0, 1, 1], [], []>} : vector<8x32xbf16>, vector<32x64xbf16>, vector<8x64xf32> -> vector<8x64xf32>
    %c0_15 = arith.constant 0 : index
    %c0_16 = arith.constant 0 : index
    %20 = vector.load %arg7[%c0_15, %c0_16] : memref<1x64xf32, #tpu.memory_space<vmem>>, vector<1x64xf32>
    %21 = vector.broadcast %20 : vector<1x64xf32> to vector<8x64xf32>
    %22 = arith.addf %19, %21 : vector<8x64xf32>
    %cst_17 = arith.constant 0.000000e+00 : f32
    %23 = vector.broadcast %cst_17 : f32 to vector<8x64xf32>
    %24 = arith.maximumf %22, %23 : vector<8x64xf32>
    %25 = arith.truncf %24 : vector<8x64xf32> to vector<8x64xbf16>
    %c0_18 = arith.constant 0 : index
    %c0_19 = arith.constant 0 : index
    %26 = vector.load %arg8[%c0_18, %c0_19] : memref<64x151xbf16, #tpu.memory_space<vmem>>, vector<64x151xbf16>
    %cst_20 = arith.constant dense<0.000000e+00> : vector<8x151xf32>
    %27 = tpu.matmul %25, %26, %cst_20 {dimension_numbers = #tpu.dot_dimension_numbers<[1], [0], [0], [1], [0, 0, 1, 1], [], []>} : vector<8x64xbf16>, vector<64x151xbf16>, vector<8x151xf32> -> vector<8x151xf32>
    %c0_21 = arith.constant 0 : index
    %c0_22 = arith.constant 0 : index
    %28 = vector.load %arg9[%c0_21, %c0_22] : memref<1x151xf32, #tpu.memory_space<vmem>>, vector<1x151xf32>
    %29 = vector.broadcast %28 : vector<1x151xf32> to vector<8x151xf32>
    %30 = arith.addf %27, %29 : vector<8x151xf32>
    %cst_23 = arith.constant 0.000000e+00 : f32
    %31 = vector.broadcast %cst_23 : f32 to vector<8x151xf32>
    %32 = arith.subf %31, %30 : vector<8x151xf32>
    %33 = math.exp %32 : vector<8x151xf32>
    %cst_24 = arith.constant 1.000000e+00 : f32
    %34 = vector.broadcast %cst_24 : f32 to vector<8x151xf32>
    %35 = arith.addf %34, %33 : vector<8x151xf32>
    %36 = tpu.reciprocal %35 {approx = true} : vector<8x151xf32> -> vector<8x151xf32>
    %c0_25 = arith.constant 0 : index
    %c0_26 = arith.constant 0 : index
    %37 = vector.load %arg10[%c0_25, %c0_26] : memref<8x151xf32, #tpu.memory_space<vmem>>, vector<8x151xf32>
    tpu.vector_store %arg10[%c0_25, %c0_26], %36 {strides = array<i32>} : memref<8x151xf32, #tpu.memory_space<vmem>>, vector<8x151xf32>,
    return
  }
  func.func @transform_0(%arg0: i32) -> (i32, i32) {
    %c0_i32 = arith.constant 0 : i32
    %c0_i32_0 = arith.constant 0 : i32
    return %arg0, %c0_i32 : i32, i32
  }
  func.func @transform_1(%arg0: i32) -> (i32, i32) {
    %c0_i32 = arith.constant 0 : i32
    %c0_i32_0 = arith.constant 0 : i32
    %c0_i32_1 = arith.constant 0 : i32
    return %c0_i32, %c0_i32_0 : i32, i32
  }
  func.func @transform_2(%arg0: i32) -> (i32, i32) {
    %c0_i32 = arith.constant 0 : i32
    %c0_i32_0 = arith.constant 0 : i32
    %c0_i32_1 = arith.constant 0 : i32
    return %c0_i32, %c0_i32_0 : i32, i32
  }
  func.func @transform_3(%arg0: i32) -> (i32, i32) {
    %c0_i32 = arith.constant 0 : i32
    %c0_i32_0 = arith.constant 0 : i32
    %c0_i32_1 = arith.constant 0 : i32
    return %c0_i32, %c0_i32_0 : i32, i32
  }
  func.func @transform_4(%arg0: i32) -> (i32, i32) {
    %c0_i32 = arith.constant 0 : i32
    %c0_i32_0 = arith.constant 0 : i32
    %c0_i32_1 = arith.constant 0 : i32
    return %c0_i32, %c0_i32_0 : i32, i32
  }
  func.func @transform_5(%arg0: i32) -> (i32, i32) {
    %c0_i32 = arith.constant 0 : i32
    %c0_i32_0 = arith.constant 0 : i32
    %c0_i32_1 = arith.constant 0 : i32
    return %c0_i32, %c0_i32_0 : i32, i32
  }
  func.func @transform_6(%arg0: i32) -> (i32, i32) {
    %c0_i32 = arith.constant 0 : i32
    %c0_i32_0 = arith.constant 0 : i32
    %c0_i32_1 = arith.constant 0 : i32
    return %c0_i32, %c0_i32_0 : i32, i32
  }
  func.func @transform_7(%arg0: i32) -> (i32, i32) {
    %c0_i32 = arith.constant 0 : i32
    %c0_i32_0 = arith.constant 0 : i32
    %c0_i32_1 = arith.constant 0 : i32
    return %c0_i32, %c0_i32_0 : i32, i32
  }
  func.func @transform_8(%arg0: i32) -> (i32, i32) {
    %c0_i32 = arith.constant 0 : i32
    %c0_i32_0 = arith.constant 0 : i32
    %c0_i32_1 = arith.constant 0 : i32
    return %c0_i32, %c0_i32_0 : i32, i32
  }
  func.func @transform_9(%arg0: i32) -> (i32, i32) {
    %c0_i32 = arith.constant 0 : i32
    %c0_i32_0 = arith.constant 0 : i32
    return %arg0, %c0_i32 : i32, i32
  }
}

</mosaic_0001>

<bundles_post_ra>
// kernel: autoencoder_forward.1
= control target key start
LH: loop header
LB: loop body
LE: loop exit
PB: predicated region body
PF: predicated region fallthrough
CT: control target
= control target key end

     0   :  { %v582_v1 = vmov 0   ;;  %v583_v4 = vmov 0.0   ;;  %vm121_vm0 = vcmask 187392   ;;  %s762_s0 = inlined_call_operand.vmem [shape: f32[8,151], index: 0, kind: input, shape index: {}]   ;;  %s763_s1 = inlined_call_operand.vmem [shape: bf16[151,64], index: 1, kind: input, shape index: {}]   ;;  %s764_s2 = inlined_call_operand.vmem [shape: f32[1,64], index: 2, kind: input, shape index: {}]   ;;  %s765_s3 = inlined_call_operand.vmem [shape: bf16[64,32], index: 3, kind: input, shape index: {}]   ;;  %s766_s4 = inlined_call_operand.vmem [shape: f32[1,32], index: 4, kind: input, shape index: {}]   ;;  %s767_s5 = inlined_call_operand.vmem [shape: bf16[32,64], index: 5, kind: input, shape index: {}]   ;;  %s768_s6 = inlined_call_operand.vmem [shape: f32[1,64], index: 6, kind: input, shape index: {}]   ;;  %s769_s7 = inlined_call_operand.vmem [shape: bf16[64,151], index: 7, kind: input, shape index: {}]   ;;  %s770_s8 = inlined_call_operand.vmem [shape: f32[1,151], index: 8, kind: input, shape index: {}]   ;;  %s771_s9 = inlined_call_operand.hbm [shape: f32[8,151], index: 9, kind: output, shape index: {}]  }
   0x1   :  { %v522_v0 = vld [vmem:[%s763_s1] sm:$0xff]   ;;  %132 = vmatprep.subr.bf16.mxu0 %v582_v1  ;;  %v523_v2 = vld [vmem:[%s763_s1 + $0x8] sm:$0xff]   ;;  %v524_v3 = vld [vmem:[%s763_s1 + $0x10] sm:$0xff]   ;;  %497 = vmatprep.subr.bf16.mxu1 %v583_v4 }
   0x2   :  { %133 = vmatpush1.bf16.msra.mxu0 %v522_v0  ;;  %v35_v5 = vld [vmem:[%s762_s0 + $0x8] sm:$0xff]  ;;  %v525_v6 = vld [vmem:[%s763_s1 + $0x18] sm:$0xff]   ;;  %v532_v8 = vld [vmem:[%s765_s3] sm:$0xff]  }
   0x3   :  { %134 = vmatprep.subr.bf16.mxu0 %v582_v1  ;;  %v37_v7 = vpack.c.bf16 %v35_v5, %v35_v5  ;;  %v526_v9 = vld [vmem:[%s763_s1 + $0x20] sm:$0xff]   ;;  %v533_v10 = vld [vmem:[%s765_s3 + $0x8] sm:$0xff]   ;;  %498 = vmatpush3.bf16.msra.mxu1 %v532_v8 }
   0x4   :  { %499 = vmatprep.subr.bf16.mxu1 %v583_v4  ;;  %v527_v11 = vld [vmem:[%s763_s1 + $0x28] sm:$0xff]  }
   0x5   :  { %469 = vmatprep.mubr.msk.bf16.mxu0 %vm121_vm0, %v37_v7 }
   0x6   :  { %135 = vmatpush1.bf16.msra.mxu0 %v523_v2 }
   0x7   :  { %136 = vmatprep.subr.bf16.mxu0 %v582_v1  ;;  %500 = vmatpush3.bf16.msra.mxu1 %v533_v10 }
   0x8   :  { %501 = vmatprep.subr.bf16.mxu1 %v583_v4 }
   0xa   :  { %137 = vmatpush1.bf16.msra.mxu0 %v524_v3 }
   0xb   :  { %138 = vmatprep.subr.bf16.mxu0 %v582_v1 }
   0xe   :  { %139 = vmatpush1.bf16.msra.mxu0 %v525_v6 }
   0xf   :  { %140 = vmatprep.subr.bf16.mxu0 %v582_v1 }
  0x12   :  { %141 = vmatpush1.bf16.msra.mxu0 %v526_v9 }
  0x13   :  { %14 = vsyncpa [#allocation3], 0  ;;  %142 = vmatprep.subr.bf16.mxu0 %v582_v1  ;;  %v528_v12 = vld [vmem:[%s763_s1 + $0x30] sm:$0xff]   ;;  %vm125_vm1 = vcmask 1042432   ;;  %v529_v13 = vld [vmem:[%s763_s1 + $0x38] sm:$0xff]   ;;  %vm126_vm2 = vcmask 1043456   ;;  %v338_v58 = vlaneseq }
  0x14   :  { %v584_v14 = vmov 65535   ;;  %v530_v16 = vld [vmem:[%s763_s1 + $0x40] sm:$0xff]   ;;  %v531_v17 = vld [vmem:[%s763_s1 + $0x48] ss:$0 sps:$4 sm:$0xff]   ;;  %v534_v22 = vld [vmem:[%s765_s3 + $0x10] sm:$0xff]   ;;  %vm585_vm3 = vmmov 0  }
  0x15   :  { %v127_v15 = vsel %vm125_vm1, 4294967295, %v584_v14  ;;  %v34_v20 = vld [vmem:[%s762_s0] sm:$0xff]  ;;  %502 = vmatpush3.bf16.msra.mxu1 %v534_v22  ;;  %v535_v23 = vld [vmem:[%s765_s3 + $0x18] sm:$0xff]   ;;  %505 = vmatprep.mubr.msk.bf16.mxu1 %vm585_vm3, %v583_v4  ;;  %vm213_vm4 = vcmask 523264   ;;  %v537_v33 = vld [vmem:[%s767_s5 + $0x8] sm:$0xff]   ;;  %vm282_vm5 = vcmask 261120  }
  0x16   :  { %143 = vmatpush1.bf16.msra.mxu0 %v527_v11  ;;  %v128_v18 = vsel %vm126_vm2, %v127_v15, 0  ;;  %v36_v21 = vpack.c.bf16 %v34_v20, %v34_v20  ;;  %503 = vmatprep.subr.bf16.mxu1 %v583_v4  ;;  %v458_v24 = vld [vmem:[%s764_s2] ss:$0 sm:$0xff]  ;;  %v540_v34 = vld [vmem:[%s769_s7 + $0x4] ss:$8 sps:$4 sm:$0xff]   ;;  %v339_v59 = vshrl.u32 %v338_v58, 7 }
  0x17   :  { %144 = vmatprep.subr.bf16.mxu0 %v582_v1  ;;  %v130_v19 = vand.u32 %v531_v17, %v128_v18  ;;  %v536_v31 = vld [vmem:[%s767_s5] sm:$0xff]   ;;  %v543_v44 = vld [vmem:[%s769_s7 + $0x14] ss:$8 sps:$4 sm:$0xff]   ;;  %v541_v45 = vld [vmem:[%s769_s7 + $0x10] ss:$8 sps:$4 sm:$0xff]  }
  0x18   :  { %v470_v35 = vld [vmem:[%s766_s4] ss:$0 sm:$0xff]  ;;  %v546_v46 = vld [vmem:[%s769_s7 + $0x24] ss:$8 sps:$4 sm:$0xff]   ;;  %v549_v48 = vld [vmem:[%s769_s7 + $0x34] ss:$8 sps:$4 sm:$0xff]  }
  0x19   :  { %504 = vmatpush3.bf16.msra.mxu1 %v535_v23  ;;  %v538_v42 = vld [vmem:[%s769_s7] ss:$8 sps:$4 sm:$0xff]   ;;  %v547_v49 = vld [vmem:[%s769_s7 + $0x30] ss:$8 sps:$4 sm:$0xff]   ;;  %v340_v60 = vsub.s32 0, %v339_v59  ;;  %v344_v62 = vsub.s32 1, %v339_v59 }
  0x1a   :  { %145 = vmatpush1.bf16.msra.mxu0 %v528_v12  ;;  %509 = vmatprep.subr.bf16.mxu1 %v583_v4  ;;  %v544_v47 = vld [vmem:[%s769_s7 + $0x20] ss:$8 sps:$4 sm:$0xff]  }
  0x1b   :  { %146 = vmatprep.subr.bf16.mxu0 %v582_v1  ;;  %v476_v50 = vld [vmem:[%s768_s6] ss:$0 sm:$0xff]  ;;  %s586_s6 = smov [#allocation2]  }
  0x1c   :  { %v336_v61 = vld [vmem:[%s770_s8] sm:$0x3]  ;;  %s450_s8 = sshll.u32 %s586_s6, 4  ;;  %s451_s8 = int_to_ptr.vmem [resolvable:$true] %s450_s8 }
  0x1d   :  { %v341_v63 = vrot.slane %v336_v61, %v340_v60  ;;  %v345_v0 = vrot.slane %v336_v61, %v344_v62  ;;  %s558_s0 = scalar_lea.vmem %s451_s8, 256  ;;  %p563_p1 = scmp.lt.s32.totalorder %s451_s8, %s451_s8 }
  0x1e   :  { %147 = vmatpush1.bf16.msra.mxu0 %v529_v13  ;;  %p559_p0 = scmp.ne.s32.totalorder %s451_s8, %s558_s0  ;;  %p564_p2 = scmp.lt.s32.totalorder %s558_s0, %s558_s0 }
  0x1f   :  { %148 = vmatprep.subr.bf16.mxu0 %v582_v1 }
  0x20   :  { %p565_p3 = por %p564_p2, %p563_p1 }
  0x22   :  { %149 = vmatpush1.bf16.msra.mxu0 %v530_v16  ;;  %p566_p4 = pnand %p565_p3, %p559_p0 }
  0x23   :  { %150 = vmatprep.subr.bf16.mxu0 %v582_v1 }
  0x26   :  { %151 = vmatpush1.bf16.msra.mxu0 %v130_v19 }
  0x29   :  { %165 = vmatmul.mubr.bf16.vlgmr.msra.gmra.mrb[0].mxu0 %v36_v21 }
  0xfc   :  { %v166_v25 = vpop.f32.mrb[0].mxu0 }
  0xfd   :  { %v167_v26 = vadd.f32 %v458_v24, %v166_v25  ;;  %v168_v27 = vpop.f32.mrb[1].mxu0 }
  0xfe   :  { %v169_v28 = vpop.f32.mrb[2].mxu0 }
  0xff   :  { %v172_v29 = vmax.f32 %v167_v26, 0.0  ;;  %v170_v30 = vpop.f32.mrb[3].mxu0 }
 0x101   :  { %v173_v32 = vpack.c.bf16 %v172_v29, %v172_v29 }
 0x103   :  { %506 = vmatmul.mubr.msk.bf16.vlgmr.msra.gmra.mrb[0].mxu1 %vm213_vm4, %v173_v32 }
 0x104   :  { %510 = vmatpush3.bf16.msra.mxu1 %v536_v31  ;;  %513 = vmatprep.mubr.msk.bf16.mxu1 %vm585_vm3, %v583_v4 }
 0x105   :  { %511 = vmatprep.subr.bf16.mxu1 %v583_v4 }
 0x108   :  { %512 = vmatpush3.bf16.msra.mxu1 %v537_v33 }
 0x109   :  { %391 = vmatprep.subr.bf16.mxu1 %v540_v34 }
 0x1d6   :  { %v251_v36 = vpop.f32.mrb[0].mxu1 }
 0x1d7   :  { %v252_v37 = vadd.f32 %v470_v35, %v251_v36  ;;  %v507_v38 = vpop.f32.mrb[1].mxu1 }
 0x1d8   :  { %v254_v39 = vpop.f32.mrb[2].mxu1 }
 0x1d9   :  { %v257_v40 = vmax.f32 %v252_v37, 0.0  ;;  %v508_v41 = vpop.f32.mrb[3].mxu1 }
 0x1db   :  { %v258_v43 = vpack.c.bf16 %v257_v40, %v257_v40 }
 0x1dd   :  { %514 = vmatmul.mubr.msk.bf16.vlgmr.msra.gmra.mrb[4].mxu1 %vm282_vm5, %v258_v43 }
 0x1de   :  { %392 = vmatpush1.bf16.msra.mxu1 %v538_v42  ;;  %423 = vmatprep.mubr.bf16.mxu1 %v582_v1 }
 0x1df   :  { %393 = vmatprep.subr.bf16.mxu1 %v543_v44 }
 0x1e2   :  { %394 = vmatpush1.bf16.msra.mxu1 %v541_v45 }
 0x1e3   :  { %395 = vmatprep.subr.bf16.mxu1 %v546_v46 }
 0x1e6   :  { %396 = vmatpush1.bf16.msra.mxu1 %v544_v47 }
 0x1e7   :  { %397 = vmatprep.subr.bf16.mxu1 %v549_v48 }
 0x1ea   :  { %398 = vmatpush1.bf16.msra.mxu1 %v547_v49 }
 0x2b0   :  { %v320_v51 = vpop.f32.mrb[4].mxu1 }
 0x2b1   :  { %v321_v52 = vadd.f32 %v476_v50, %v320_v51  ;;  %v515_v53 = vpop.f32.mrb[5].mxu1 }
 0x2b2   :  { %v323_v54 = vpop.f32.mrb[6].mxu1 }
 0x2b3   :  { %v326_v55 = vmax.f32 %v321_v52, 0.0  ;;  %v516_v56 = vpop.f32.mrb[7].mxu1 }
 0x2b5   :  { %v327_v57 = vpack.c.bf16 %v326_v55, %v326_v55 }
 0x2b7   :  { %488 = vmatmul.mubr.msk.bf16.vlgmr.msra.gmra.mrb[8].mxu1 %vm213_vm4, %v327_v57 }
 0x38a   :  { %v425_v1 = vpop.f32.mrb[8].mxu1 }
 0x38b   :  { %v426_v2 = vadd.f32 %v425_v1, %v341_v63  ;;  %v427_v3 = vpop.f32.mrb[9].mxu1 }
 0x38c   :  { %v428_v4 = vadd.f32 %v427_v3, %v345_v0  ;;  %v429_v5 = vpop.f32.mrb[10].mxu1 }
 0x38d   :  { %v432_v6 = vsub.f32 0.0, %v426_v2  ;;  %v430_v7 = vpop.f32.mrb[11].mxu1 }
 0x38e   :  { %v433_v8 = vsub.f32 0.0, %v428_v4 }
 0x38f   :  { %v434_v9 = vmul.f32 1.442695, %v432_v6 }
 0x390   :  { %v436_v10 = vmul.f32 1.442695, %v433_v8 }
 0x391   :  { %550 = vpow2.f32 %v434_v9 }
 0x392   :  { %552 = vpow2.f32 %v436_v10 }
 0x39b   :  { %v551_v11 = vpop.eup %550 }
 0x39c   :  { %v553_v12 = vpop.eup %552  ;;  %v438_v13 = vadd.f32 1.0, %v551_v11 }
 0x39d   :  { %v439_v14 = vadd.f32 1.0, %v553_v12 }
 0x39e   :  { %554 = vrcp.f32 %v438_v13 }
 0x39f   :  { %556 = vrcp.f32 %v439_v14 }
 0x3a8   :  { %v555_v15 = vpop.eup %554 }
 0x3a9   :  { %v557_v16 = vpop.eup %556  ;;  %442 = vst [vmem:[#allocation2] sm:$0xff] %v555_v15 }
 0x3aa   :  { %443 = vst.msk [vmem:[#allocation2 + $0x8] sm:$0xff] %vm121_vm0, %v557_v16 }
 0x3ab   :  { %569 = shalt.err (!%p566_p4)
}
 0x3ac   :  { %s570_s21 = scalar_lea.hbm %s771_s9, 256 }
 0x3ad   :  { %p571_p5 = scmp.ne.s32.totalorder %s771_s9, %s570_s21  ;;  %p574_p6 = scmp.lt.u32.totalorder %s570_s21, %s771_s9 }
 0x3af   :  { %p576_p7 = pnand %p574_p6, %p571_p5 }
 0x3b1   :  { %579 = shalt.err (!%p576_p7)
}
 0x3b2   :  { %453 = dma.vmem_to_hbm [thread:$0]  %s451_s8, 256, %s771_s9, [#allocation3]  }
 0x3b3   :  { %580 = dma.done.wait [#allocation3], 256  }
 0x3b4   :  { %581 = vsyncadd [#allocation3], 4294967040 }
 0x3b5   :  { %457 = vsyncpa [#allocation3], 1 }

</bundles_post_ra>
